<compile_context>
chip_gen: v7x
topology: tpu7x:2x2x1
jax: 0.10.0
libtpu: 0.0.40
codegen_flags: <defaults>
</compile_context>

<pallas_src>
import functools
import math

import jax
import jax.numpy as jnp
from jax.experimental import pallas as pl
from jax.experimental.pallas import tpu as pltpu

_LANE = 128
_SUBLANE = 8


def _round_up(a: int, b: int) -> int:
    return (a + b - 1) // b * b


@functools.lru_cache(maxsize=None)
def _vmem_capacity_bytes() -> int:
    """Physical VMEM per TensorCore for the current TPU generation."""
    try:
        return int(pltpu.get_tpu_info().vmem_capacity_bytes)
    except Exception:
        # Narrow fallback around the hardware query only (NOT around the kernel
        # build/run): assume the smallest per-TC VMEM (v7x, 64 MiB).
        return 64 << 20


def _linear_kernel(x_ref, wt_ref, b_ref, o_ref):
    # x_ref: (TM, hid)  wt_ref: (hid, OUT_P)  b_ref: (1, OUT_P)  o_ref: (TM, OUT_P)
    # TODO(synk): expose precision=jax.lax.Precision.HIGHEST if exact fp32
    # parity is required at very large hid; default already matches 1e-5 here.
    acc = jnp.dot(x_ref[...], wt_ref[...], preferred_element_type=jnp.float32)
    o_ref[...] = (acc + b_ref[...]).astype(o_ref.dtype)


def _linear_kernel_ktiled(x_ref, wt_ref, b_ref, o_ref, acc_ref):
    # Reduction over hid split across grid axis 1 ("arbitrary"); f32 accumulator
    # lives in VMEM scratch and is initialized / finalized with pl.when.
    k = pl.program_id(1)

    @pl.when(k == 0)
    def _init():
        acc_ref[...] = jnp.zeros_like(acc_ref)

    acc_ref[...] += jnp.dot(x_ref[...], wt_ref[...],
                            preferred_element_type=jnp.float32)

    @pl.when(k == pl.num_programs(1) - 1)
    def _finalize():
        o_ref[...] = (acc_ref[...] + b_ref[...]).astype(o_ref.dtype)


def _choose_row_tile(n_rows, k_extent, out_p, x_itemsize, w_itemsize,
                     o_itemsize, with_acc, vmem_budget):
    """Largest row tile that fits the per-generation VMEM budget."""
    # Resident (grid-invariant) operands: W^T block + bias block, double-buffered.
    fixed = 2 * k_extent * out_p * w_itemsize + 2 * _SUBLANE * out_p * 4
    # Per-row cost: double-buffered x tile + double-buffered out tile (+ f32 acc).
    per_row = 2 * k_extent * x_itemsize + 2 * out_p * o_itemsize
    if with_acc:
        per_row += out_p * 4
    tile = max((vmem_budget - fixed) // per_row, _SUBLANE)
    tile = min(tile, 4096, _round_up(n_rows, _SUBLANE))
    if n_rows > 1024:
        # Keep >= 2 row tiles so dimension_semantics=("parallel",) can shard the
        # grid across v7x's two TensorCores (cost elsewhere: ~0.35us per step).
        tile = min(tile, _round_up(pl.cdiv(n_rows, 2), _SUBLANE))
    tile = max(_SUBLANE, (tile // _SUBLANE) * _SUBLANE)
    vmem_needed = fixed + tile * per_row
    return int(tile), int(vmem_needed)


@functools.partial(jax.jit, static_argnames=("out_dim", "k_tile"))
def _logreg_forward_impl(x, w_t, b_p, *, out_dim, k_tile):
    n_rows, hid = x.shape
    hid_p, out_p = w_t.shape
    out_dtype = x.dtype  # keep nn.Linear output dtype even on the bf16 path

    if x.dtype != w_t.dtype:
        x = x.astype(w_t.dtype)  # bf16 compute path (f32 accumulation in-kernel)
    if hid_p != hid:
        # K-tiled path only: zero-pad hid so every K block divides evenly
        # (zero columns contribute nothing to the dot product).
        x = jnp.pad(x, ((0, 0), (0, hid_p - hid)))

    cap = _vmem_capacity_bytes()
    budget = (cap * 3) // 4  # headroom for compiler-internal scratch
    k_extent = k_tile if k_tile is not None else hid_p
    tile, vmem_needed = _choose_row_tile(
        n_rows, k_extent, out_p, x.dtype.itemsize, w_t.dtype.itemsize,
        jnp.dtype(out_dtype).itemsize, with_acc=k_tile is not None,
        vmem_budget=budget)
    grid_m = pl.cdiv(n_rows, tile)

    cost = pl.CostEstimate(
        flops=2 * n_rows * hid_p * out_p,
        transcendentals=0,
        bytes_accessed=(x.size * x.dtype.itemsize
                        + w_t.size * w_t.dtype.itemsize
                        + b_p.size * b_p.dtype.itemsize
                        + n_rows * out_p * jnp.dtype(out_dtype).itemsize),
    )
    # Always pass an explicit scoped-VMEM limit (v5e's default is only 16 MiB),
    # capped per generation rather than at a fixed 64 MiB.
    vmem_limit = int(min(max(vmem_needed * 3 // 2, 32 << 20), (cap * 9) // 10))
    out_shape = jax.ShapeDtypeStruct((n_rows, out_p), out_dtype)

    if k_tile is None:
        out = pl.pallas_call(
            _linear_kernel,
            out_shape=out_shape,
            grid_spec=pltpu.PrefetchScalarGridSpec(
                num_scalar_prefetch=0,
                grid=(grid_m,),
                in_specs=[
                    pl.BlockSpec((tile, hid_p), lambda i: (i, 0)),   # x row tile
                    pl.BlockSpec((hid_p, out_p), lambda i: (0, 0)),  # W^T (resident)
                    pl.BlockSpec((1, out_p), lambda i: (0, 0)),      # bias (resident)
                ],
                out_specs=pl.BlockSpec((tile, out_p), lambda i: (i, 0)),
            ),
            compiler_params=pltpu.CompilerParams(
                dimension_semantics=("parallel",),
                vmem_limit_bytes=vmem_limit,
            ),
            cost_estimate=cost,
        )(x, w_t, b_p)
    else:
        grid_k = hid_p // k_tile
        out = pl.pallas_call(
            _linear_kernel_ktiled,
            out_shape=out_shape,
            grid_spec=pltpu.PrefetchScalarGridSpec(
                num_scalar_prefetch=0,
                grid=(grid_m, grid_k),
                in_specs=[
                    pl.BlockSpec((tile, k_tile), lambda i, k: (i, k)),
                    pl.BlockSpec((k_tile, out_p), lambda i, k: (k, 0)),
                    pl.BlockSpec((1, out_p), lambda i, k: (0, 0)),
                ],
                out_specs=pl.BlockSpec((tile, out_p), lambda i, k: (i, 0)),
                scratch_shapes=[pltpu.VMEM((tile, out_p), jnp.float32)],
            ),
            compiler_params=pltpu.CompilerParams(
                dimension_semantics=("parallel", "arbitrary"),
                vmem_limit_bytes=vmem_limit,
            ),
            cost_estimate=cost,
        )(x, w_t, b_p)

    # Drop the lane padding; this slice is fused into the same jitted program.
    return out[:, :out_dim]


class LogRegPallas:
    """Pallas TPU equivalent of LogReg(hid_dim, out_dim): y = x @ W.T + b."""

    def __init__(self, weight, bias, *, compute_dtype=None, _force_k_tile=None):
        out_dim, hid = weight.shape
        assert bias.shape == (out_dim,)
        self.out_dim = int(out_dim)

        w_dtype = (jnp.dtype(compute_dtype) if compute_dtype is not None
                   else jnp.dtype(weight.dtype))
        out_p = _round_up(max(out_dim, 1), _LANE)  # lane-dense output columns

        # Decide once, at parameter-load time, whether W^T stays fully resident
        # or must be K-tiled because it would eat too much of the VMEM budget.
        budget = (_vmem_capacity_bytes() * 3) // 4
        resident_bytes = 2 * hid * out_p * w_dtype.itemsize
        if _force_k_tile is not None:
            k_tile = int(_force_k_tile)
        elif resident_bytes > budget // 4:
            per_k_row = 2 * out_p * w_dtype.itemsize
            k_tile = max(_LANE, ((budget // 4) // per_k_row) // _LANE * _LANE)
            k_tile = min(k_tile, _round_up(hid, _LANE))
        else:
            k_tile = None
        hid_p = hid if k_tile is None else _round_up(hid, k_tile)

        # Built once and cached: zero-padded, pre-transposed weight + padded bias.
        w_t = jnp.zeros((hid_p, out_p), w_dtype)
        w_t = w_t.at[:hid, :out_dim].set(jnp.asarray(weight).T.astype(w_dtype))
        b_p = jnp.zeros((1, out_p), jnp.float32)
        b_p = b_p.at[:, :out_dim].set(jnp.asarray(bias, jnp.float32)[None, :])

        self.w_t, self.b_p, self.k_tile = w_t, b_p, k_tile

    def __call__(self, x):
        assert x.ndim == 2, "LogReg expects (N, hid_dim) inputs"
        return _logreg_forward_impl(x, self.w_t, self.b_p,
                                    out_dim=self.out_dim, k_tile=self.k_tile)


def logreg_forward(x, weight, bias, **kwargs):
    """One-shot functional form (for repeated calls, cache a LogRegPallas)."""
    return LogRegPallas(weight, bias, **kwargs)(x)


if __name__ == "__main__":
    # Shapes consistent with LogReg(hid_dim, out_dim): x is (N, hid_dim).
    N, hid_dim, out_dim = 256, 32, 16

    key = jax.random.PRNGKey(0)
    kx, kw, kb, kx2, kw2, kb2 = jax.random.split(key, 6)

    x = jax.random.normal(kx, (N, hid_dim), dtype=jnp.float32)
    bound = 1.0 / math.sqrt(hid_dim)
    weight = jax.random.uniform(kw, (out_dim, hid_dim), dtype=jnp.float32,
                                minval=-bound, maxval=bound)
    bias = jax.random.uniform(kb, (out_dim,), dtype=jnp.float32,
                              minval=-bound, maxval=bound)

    model = LogRegPallas(weight, bias)  # params prepared & cached once

    out = jax.block_until_ready(model(x))
    ref = x @ weight.T + bias
    assert out.shape == (N, out_dim)
    assert jnp.allclose(out, ref, atol=1e-5, rtol=1e-5), "mismatch vs reference"

    # Non-multiple-of-8 batch: exercises the masked partial edge tile (no x pad).
    N2 = 300
    x2 = jax.random.normal(kx2, (N2, hid_dim), dtype=jnp.float32)
    out2 = jax.block_until_ready(model(x2))
    ref2 = x2 @ weight.T + bias
    assert out2.shape == (N2, out_dim)
    assert jnp.allclose(out2, ref2, atol=1e-5, rtol=1e-5), "mismatch (edge tile)"

    # bf16 compute path (f32 accumulation, f32 output), looser tolerance.
    model_bf16 = LogRegPallas(weight, bias, compute_dtype=jnp.bfloat16)
    out3 = jax.block_until_ready(model_bf16(x))
    assert out3.dtype == jnp.float32 and out3.shape == (N, out_dim)
    assert jnp.allclose(out3, ref, atol=3e-2, rtol=3e-2), "mismatch (bf16 path)"

    # K-tiled fallback path, forced at a small shape so it is exercised here.
    hid_big = 256
    xk = jax.random.normal(kx, (N, hid_big), dtype=jnp.float32)
    wk = jax.random.uniform(kw2, (out_dim, hid_big), dtype=jnp.float32,
                            minval=-bound, maxval=bound)
    bk = jax.random.uniform(kb2, (out_dim,), dtype=jnp.float32,
                            minval=-bound, maxval=bound)
    model_k = LogRegPallas(wk, bk, _force_k_tile=128)
    out4 = jax.block_until_ready(model_k(xk))
    ref4 = xk @ wk.T + bk
    assert out4.shape == (N, out_dim)
    assert jnp.allclose(out4, ref4, atol=1e-3, rtol=1e-3), "mismatch (K-tiled)"

    print("KERNEL_OK")
</pallas_src>

<mosaic_0001>
module attributes {stable_mosaic.version = 11 : i64} {
  func.func @_linear_kernel(%arg0: i32, %arg1: memref<256x32xf32, #tpu.memory_space<vmem>>, %arg2: memref<32x128xf32, #tpu.memory_space<vmem>>, %arg3: memref<1x128xf32, #tpu.memory_space<vmem>>, %arg4: memref<256x128xf32, #tpu.memory_space<vmem>>) attributes {dimension_semantics = [#tpu.dimension_semantics<parallel>], iteration_bounds = array<i64: 1>, scalar_prefetch = 0 : i64, scratch_operands = 0 : i64, tpu.core_type = #tpu.core_type<tc>, window_params = [{transform_indices = @transform_0, window_bounds = array<i64: 256, 32>}, {pipeline_mode = #tpu.pipeline_mode<synchronous>, transform_indices = @transform_1, window_bounds = array<i64: 32, 128>}, {pipeline_mode = #tpu.pipeline_mode<synchronous>, transform_indices = @transform_2, window_bounds = array<i64: 1, 128>}, {transform_indices = @transform_3, window_bounds = array<i64: 256, 128>}]} {
    %c0 = arith.constant 0 : index
    %c0_0 = arith.constant 0 : index
    %0 = vector.load %arg1[%c0, %c0_0] : memref<256x32xf32, #tpu.memory_space<vmem>>, vector<256x32xf32>
    %c0_1 = arith.constant 0 : index
    %c0_2 = arith.constant 0 : index
    %1 = vector.load %arg2[%c0_1, %c0_2] : memref<32x128xf32, #tpu.memory_space<vmem>>, vector<32x128xf32>
    %cst = arith.constant dense<0.000000e+00> : vector<256x128xf32>
    %2 = tpu.matmul %0, %1, %cst {dimension_numbers = #tpu.dot_dimension_numbers<[1], [0], [0], [1], [0, 0, 1, 1], [], []>} : vector<256x32xf32>, vector<32x128xf32>, vector<256x128xf32> -> vector<256x128xf32>
    %c0_3 = arith.constant 0 : index
    %c0_4 = arith.constant 0 : index
    %3 = vector.load %arg3[%c0_3, %c0_4] : memref<1x128xf32, #tpu.memory_space<vmem>>, vector<1x128xf32>
    %4 = vector.broadcast %3 : vector<1x128xf32> to vector<256x128xf32>
    %5 = arith.addf %2, %4 : vector<256x128xf32>
    %c0_5 = arith.constant 0 : index
    %c0_6 = arith.constant 0 : index
    %6 = vector.load %arg4[%c0_5, %c0_6] : memref<256x128xf32, #tpu.memory_space<vmem>>, vector<256x128xf32>
    tpu.vector_store %arg4[%c0_5, %c0_6], %5 {strides = array<i32>} : memref<256x128xf32, #tpu.memory_space<vmem>>, vector<256x128xf32>,
    return
  }
  func.func @transform_0(%arg0: i32) -> (i32, i32) {
    %c0_i32 = arith.constant 0 : i32
    %c0_i32_0 = arith.constant 0 : i32
    return %arg0, %c0_i32 : i32, i32
  }
  func.func @transform_1(%arg0: i32) -> (i32, i32) {
    %c0_i32 = arith.constant 0 : i32
    %c0_i32_0 = arith.constant 0 : i32
    %c0_i32_1 = arith.constant 0 : i32
    return %c0_i32, %c0_i32_0 : i32, i32
  }
  func.func @transform_2(%arg0: i32) -> (i32, i32) {
    %c0_i32 = arith.constant 0 : i32
    %c0_i32_0 = arith.constant 0 : i32
    %c0_i32_1 = arith.constant 0 : i32
    return %c0_i32, %c0_i32_0 : i32, i32
  }
  func.func @transform_3(%arg0: i32) -> (i32, i32) {
    %c0_i32 = arith.constant 0 : i32
    %c0_i32_0 = arith.constant 0 : i32
    return %arg0, %c0_i32 : i32, i32
  }
}

</mosaic_0001>

<bundles_post_ra>
// kernel: _logreg_forward_impl.1
= control target key start
LH: loop header
LB: loop body
LE: loop exit
PB: predicated region body
PF: predicated region fallthrough
CT: control target
= control target key end

     0   :  { %vm57_vm0 = vcmask 261120   ;;  %s845_s1 = inlined_call_operand.vmem [shape: f32[32,128], index: 1, kind: input, shape index: {}]   ;;  %s846_s0 = inlined_call_operand.vmem [shape: f32[256,32], index: 0, kind: input, shape index: {}]   ;;  %s847_s2 = inlined_call_operand.vmem [shape: f32[1,128], index: 2, kind: input, shape index: {}]   ;;  %s848_s3 = inlined_call_operand.vmem [shape: f32[256,128], index: 3, kind: output, shape index: {}]  }
   0x1   :  { %v46_v0 = vld [vmem:[%s845_s1] sm:$0xff]  ;;  %v47_v1 = vld [vmem:[%s845_s1 + $0x8] sm:$0xff]  ;;  %v48_v2 = vld [vmem:[%s845_s1 + $0x10] sm:$0xff] }
   0x2   :  { %v540_v3 = vpack.c.bf16 %v47_v1, %v46_v0  ;;  %v49_v4 = vld [vmem:[%s845_s1 + $0x18] sm:$0xff]  ;;  %v14_v5 = vld [vmem:[%s846_s0] sm:$0xff]  ;;  %v15_v8 = vld [vmem:[%s846_s0 + $0x8] sm:$0xff] }
   0x3   :  { %v30_v6 = vld [vmem:[%s846_s0 + $0x80] sm:$0xff]  ;;  %v544_v7 = vpack.c.bf16 %v49_v4, %v48_v2  ;;  %492 = vmatprep.mubr.msk.f32.mxu0 %vm57_vm0, %v14_v5  ;;  %v31_v9 = vld [vmem:[%s846_s0 + $0x88] sm:$0xff]  ;;  %v16_v10 = vld [vmem:[%s846_s0 + $0x10] sm:$0xff] }
   0x4   :  { %516 = vmatprep.mubr.msk.f32.mxu1 %vm57_vm0, %v30_v6  ;;  %541 = vmatprep.subr.bf16.mxu0 %v540_v3  ;;  %v32_v11 = vld [vmem:[%s846_s0 + $0x90] sm:$0xff]  ;;  %v17_v12 = vld [vmem:[%s846_s0 + $0x18] sm:$0xff]  ;;  %v18_v14 = vld [vmem:[%s846_s0 + $0x20] sm:$0xff] }
   0x5   :  { %548 = vmatprep.subr.bf16.mxu1 %v540_v3  ;;  %543 = vmatpush3.bf16.msra.mxu0 %v540_v3  ;;  %v33_v13 = vld [vmem:[%s846_s0 + $0x98] sm:$0xff]  ;;  %v34_v15 = vld [vmem:[%s846_s0 + $0xa0] sm:$0xff]  ;;  %v19_v16 = vld [vmem:[%s846_s0 + $0x28] sm:$0xff] }
   0x6   :  { %550 = vmatpush3.bf16.msra.mxu1 %v540_v3  ;;  %545 = vmatprep.subr.bf16.mxu0 %v544_v7  ;;  %v35_v17 = vld [vmem:[%s846_s0 + $0xa8] sm:$0xff]  ;;  %v20_v18 = vld [vmem:[%s846_s0 + $0x30] sm:$0xff]  ;;  %v21_v20 = vld [vmem:[%s846_s0 + $0x38] sm:$0xff] }
   0x7   :  { %549 = vmatprep.subr.bf16.mxu1 %v544_v7  ;;  %v36_v19 = vld [vmem:[%s846_s0 + $0xb0] sm:$0xff]  ;;  %v37_v21 = vld [vmem:[%s846_s0 + $0xb8] sm:$0xff]  ;;  %v22_v22 = vld [vmem:[%s846_s0 + $0x40] sm:$0xff] }
   0x8   :  { %v38_v23 = vld [vmem:[%s846_s0 + $0xc0] sm:$0xff]  ;;  %v23_v24 = vld [vmem:[%s846_s0 + $0x48] sm:$0xff]  ;;  %v24_v26 = vld [vmem:[%s846_s0 + $0x50] sm:$0xff] }
   0x9   :  { %547 = vmatpush3.bf16.msra.mxu0 %v544_v7  ;;  %v39_v25 = vld [vmem:[%s846_s0 + $0xc8] sm:$0xff]  ;;  %v40_v27 = vld [vmem:[%s846_s0 + $0xd0] sm:$0xff]  ;;  %v25_v28 = vld [vmem:[%s846_s0 + $0x58] sm:$0xff] }
   0xa   :  { %551 = vmatpush3.bf16.msra.mxu1 %v544_v7  ;;  %v41_v29 = vld [vmem:[%s846_s0 + $0xd8] sm:$0xff]  ;;  %v26_v30 = vld [vmem:[%s846_s0 + $0x60] sm:$0xff]  ;;  %v27_v32 = vld [vmem:[%s846_s0 + $0x68] sm:$0xff] }
   0xb   :  { %v42_v31 = vld [vmem:[%s846_s0 + $0xe0] sm:$0xff]  ;;  %v43_v33 = vld [vmem:[%s846_s0 + $0xe8] sm:$0xff]  ;;  %v28_v34 = vld [vmem:[%s846_s0 + $0x70] sm:$0xff] }
   0xc   :  { %493 = vmatmul.mubr.msk.f32.vlgmr.msra.gmra.mrb[0].mxu0 %vm57_vm0, %v15_v8  ;;  %v44_v35 = vld [vmem:[%s846_s0 + $0xf0] sm:$0xff]  ;;  %v29_v36 = vld [vmem:[%s846_s0 + $0x78] sm:$0xff]  ;;  %v715_v38 = vld [vmem:[%s847_s2] ss:$0 sm:$0xff] }
   0xd   :  { %517 = vmatmul.mubr.msk.f32.vlgmr.msra.gmra.mrb[0].mxu1 %vm57_vm0, %v31_v9  ;;  %495 = vmatprep.mubr.msk.f32.mxu0 %vm57_vm0, %v16_v10  ;;  %v45_v37 = vld [vmem:[%s846_s0 + $0xf8] sm:$0xff] }
   0xe   :  { %519 = vmatprep.mubr.msk.f32.mxu1 %vm57_vm0, %v32_v11 }
  0x10   :  { %496 = vmatmul.mubr.msk.f32.gmra.mrb[2].mxu0 %vm57_vm0, %v17_v12 }
  0x11   :  { %520 = vmatmul.mubr.msk.f32.gmra.mrb[2].mxu1 %vm57_vm0, %v33_v13  ;;  %498 = vmatprep.mubr.msk.f32.mxu0 %vm57_vm0, %v18_v14 }
  0x12   :  { %522 = vmatprep.mubr.msk.f32.mxu1 %vm57_vm0, %v34_v15 }
  0x14   :  { %499 = vmatmul.mubr.msk.f32.gmra.mrb[4].mxu0 %vm57_vm0, %v19_v16 }
  0x15   :  { %523 = vmatmul.mubr.msk.f32.gmra.mrb[4].mxu1 %vm57_vm0, %v35_v17  ;;  %501 = vmatprep.mubr.msk.f32.mxu0 %vm57_vm0, %v20_v18 }
  0x16   :  { %525 = vmatprep.mubr.msk.f32.mxu1 %vm57_vm0, %v36_v19 }
  0x18   :  { %502 = vmatmul.mubr.msk.f32.gmra.mrb[6].mxu0 %vm57_vm0, %v21_v20 }
  0x19   :  { %526 = vmatmul.mubr.msk.f32.gmra.mrb[6].mxu1 %vm57_vm0, %v37_v21  ;;  %504 = vmatprep.mubr.msk.f32.mxu0 %vm57_vm0, %v22_v22 }
  0x1a   :  { %528 = vmatprep.mubr.msk.f32.mxu1 %vm57_vm0, %v38_v23 }
  0x1c   :  { %505 = vmatmul.mubr.msk.f32.gmra.mrb[8].mxu0 %vm57_vm0, %v23_v24 }
  0x1d   :  { %529 = vmatmul.mubr.msk.f32.gmra.mrb[8].mxu1 %vm57_vm0, %v39_v25  ;;  %507 = vmatprep.mubr.msk.f32.mxu0 %vm57_vm0, %v24_v26 }
  0x1e   :  { %531 = vmatprep.mubr.msk.f32.mxu1 %vm57_vm0, %v40_v27 }
  0x20   :  { %508 = vmatmul.mubr.msk.f32.gmra.mrb[10].mxu0 %vm57_vm0, %v25_v28 }
  0x21   :  { %532 = vmatmul.mubr.msk.f32.gmra.mrb[10].mxu1 %vm57_vm0, %v41_v29  ;;  %510 = vmatprep.mubr.msk.f32.mxu0 %vm57_vm0, %v26_v30 }
  0x22   :  { %534 = vmatprep.mubr.msk.f32.mxu1 %vm57_vm0, %v42_v31 }
  0x24   :  { %511 = vmatmul.mubr.msk.f32.gmra.mrb[12].mxu0 %vm57_vm0, %v27_v32 }
  0x25   :  { %535 = vmatmul.mubr.msk.f32.gmra.mrb[12].mxu1 %vm57_vm0, %v43_v33  ;;  %513 = vmatprep.mubr.msk.f32.mxu0 %vm57_vm0, %v28_v34 }
  0x26   :  { %537 = vmatprep.mubr.msk.f32.mxu1 %vm57_vm0, %v44_v35 }
  0x28   :  { %514 = vmatmul.mubr.msk.f32.gmra.mrb[14].mxu0 %vm57_vm0, %v29_v36 }
  0x29   :  { %538 = vmatmul.mubr.msk.f32.gmra.mrb[14].mxu1 %vm57_vm0, %v45_v37 }
  0xdf   :  { %v494_v39 = vpop.f32.mrb[0].mxu0 }
  0xe0   :  { %v518_v40 = vpop.f32.mrb[0].mxu1  ;;  %v226_v41 = vadd.f32 %v494_v39, %v715_v38  ;;  %v220_v43 = vpop.f32.mrb[1].mxu0 }
  0xe1   :  { %v306_v42 = vadd.f32 %v518_v40, %v715_v38  ;;  %v300_v44 = vpop.f32.mrb[1].mxu1  ;;  %v221_v45 = vadd.f32 %v715_v38, %v220_v43 }
  0xe2   :  { %v301_v46 = vadd.f32 %v715_v38, %v300_v44  ;;  %380 = vst [vmem:[%s848_s3 + $0x8] sm:$0xff] %v226_v41 }
  0xe3   :  { %396 = vst [vmem:[%s848_s3 + $0x88] sm:$0xff] %v306_v42  ;;  %379 = vst [vmem:[%s848_s3] sm:$0xff] %v221_v45  ;;  %v497_v47 = vpop.f32.mrb[2].mxu0 }
  0xe4   :  { %395 = vst [vmem:[%s848_s3 + $0x80] sm:$0xff] %v301_v46  ;;  %v521_v48 = vpop.f32.mrb[2].mxu1  ;;  %v236_v49 = vadd.f32 %v497_v47, %v715_v38  ;;  %v230_v51 = vpop.f32.mrb[3].mxu0 }
  0xe5   :  { %v316_v50 = vadd.f32 %v521_v48, %v715_v38  ;;  %v310_v52 = vpop.f32.mrb[3].mxu1  ;;  %v231_v53 = vadd.f32 %v715_v38, %v230_v51 }
  0xe6   :  { %v311_v54 = vadd.f32 %v715_v38, %v310_v52  ;;  %382 = vst [vmem:[%s848_s3 + $0x18] sm:$0xff] %v236_v49 }
  0xe7   :  { %398 = vst [vmem:[%s848_s3 + $0x98] sm:$0xff] %v316_v50  ;;  %381 = vst [vmem:[%s848_s3 + $0x10] sm:$0xff] %v231_v53  ;;  %v500_v55 = vpop.f32.mrb[4].mxu0 }
  0xe8   :  { %397 = vst [vmem:[%s848_s3 + $0x90] sm:$0xff] %v311_v54  ;;  %v524_v56 = vpop.f32.mrb[4].mxu1  ;;  %v246_v57 = vadd.f32 %v500_v55, %v715_v38  ;;  %v240_v59 = vpop.f32.mrb[5].mxu0 }
  0xe9   :  { %v326_v58 = vadd.f32 %v524_v56, %v715_v38  ;;  %v320_v60 = vpop.f32.mrb[5].mxu1  ;;  %v241_v61 = vadd.f32 %v715_v38, %v240_v59 }
  0xea   :  { %v321_v62 = vadd.f32 %v715_v38, %v320_v60  ;;  %384 = vst [vmem:[%s848_s3 + $0x28] sm:$0xff] %v246_v57 }
  0xeb   :  { %400 = vst [vmem:[%s848_s3 + $0xa8] sm:$0xff] %v326_v58  ;;  %383 = vst [vmem:[%s848_s3 + $0x20] sm:$0xff] %v241_v61  ;;  %v503_v63 = vpop.f32.mrb[6].mxu0 }
  0xec   :  { %399 = vst [vmem:[%s848_s3 + $0xa0] sm:$0xff] %v321_v62  ;;  %v527_v0 = vpop.f32.mrb[6].mxu1  ;;  %v256_v1 = vadd.f32 %v503_v63, %v715_v38  ;;  %v250_v3 = vpop.f32.mrb[7].mxu0 }
  0xed   :  { %v336_v2 = vadd.f32 %v527_v0, %v715_v38  ;;  %v330_v4 = vpop.f32.mrb[7].mxu1  ;;  %v251_v5 = vadd.f32 %v715_v38, %v250_v3 }
  0xee   :  { %v331_v6 = vadd.f32 %v715_v38, %v330_v4  ;;  %386 = vst [vmem:[%s848_s3 + $0x38] sm:$0xff] %v256_v1 }
  0xef   :  { %402 = vst [vmem:[%s848_s3 + $0xb8] sm:$0xff] %v336_v2  ;;  %385 = vst [vmem:[%s848_s3 + $0x30] sm:$0xff] %v251_v5  ;;  %v506_v7 = vpop.f32.mrb[8].mxu0 }
  0xf0   :  { %401 = vst [vmem:[%s848_s3 + $0xb0] sm:$0xff] %v331_v6  ;;  %v530_v8 = vpop.f32.mrb[8].mxu1  ;;  %v266_v9 = vadd.f32 %v506_v7, %v715_v38  ;;  %v260_v11 = vpop.f32.mrb[9].mxu0 }
  0xf1   :  { %v346_v10 = vadd.f32 %v530_v8, %v715_v38  ;;  %v340_v12 = vpop.f32.mrb[9].mxu1  ;;  %v261_v13 = vadd.f32 %v715_v38, %v260_v11 }
  0xf2   :  { %v341_v14 = vadd.f32 %v715_v38, %v340_v12  ;;  %388 = vst [vmem:[%s848_s3 + $0x48] sm:$0xff] %v266_v9 }
  0xf3   :  { %404 = vst [vmem:[%s848_s3 + $0xc8] sm:$0xff] %v346_v10  ;;  %387 = vst [vmem:[%s848_s3 + $0x40] sm:$0xff] %v261_v13  ;;  %v509_v15 = vpop.f32.mrb[10].mxu0 }
  0xf4   :  { %403 = vst [vmem:[%s848_s3 + $0xc0] sm:$0xff] %v341_v14  ;;  %v533_v16 = vpop.f32.mrb[10].mxu1  ;;  %v276_v17 = vadd.f32 %v509_v15, %v715_v38  ;;  %v270_v19 = vpop.f32.mrb[11].mxu0 }
  0xf5   :  { %v356_v18 = vadd.f32 %v533_v16, %v715_v38  ;;  %v350_v20 = vpop.f32.mrb[11].mxu1  ;;  %v271_v21 = vadd.f32 %v715_v38, %v270_v19 }
  0xf6   :  { %v351_v22 = vadd.f32 %v715_v38, %v350_v20  ;;  %390 = vst [vmem:[%s848_s3 + $0x58] sm:$0xff] %v276_v17 }
  0xf7   :  { %406 = vst [vmem:[%s848_s3 + $0xd8] sm:$0xff] %v356_v18  ;;  %389 = vst [vmem:[%s848_s3 + $0x50] sm:$0xff] %v271_v21  ;;  %v512_v23 = vpop.f32.mrb[12].mxu0 }
  0xf8   :  { %405 = vst [vmem:[%s848_s3 + $0xd0] sm:$0xff] %v351_v22  ;;  %v536_v24 = vpop.f32.mrb[12].mxu1  ;;  %v286_v25 = vadd.f32 %v512_v23, %v715_v38  ;;  %v280_v27 = vpop.f32.mrb[13].mxu0 }
  0xf9   :  { %v366_v26 = vadd.f32 %v536_v24, %v715_v38  ;;  %v360_v28 = vpop.f32.mrb[13].mxu1  ;;  %v281_v29 = vadd.f32 %v715_v38, %v280_v27 }
  0xfa   :  { %v361_v30 = vadd.f32 %v715_v38, %v360_v28  ;;  %392 = vst [vmem:[%s848_s3 + $0x68] sm:$0xff] %v286_v25 }
  0xfb   :  { %408 = vst [vmem:[%s848_s3 + $0xe8] sm:$0xff] %v366_v26  ;;  %391 = vst [vmem:[%s848_s3 + $0x60] sm:$0xff] %v281_v29  ;;  %v515_v31 = vpop.f32.mrb[14].mxu0 }
  0xfc   :  { %407 = vst [vmem:[%s848_s3 + $0xe0] sm:$0xff] %v361_v30  ;;  %v539_v32 = vpop.f32.mrb[14].mxu1  ;;  %v296_v33 = vadd.f32 %v515_v31, %v715_v38  ;;  %v290_v35 = vpop.f32.mrb[15].mxu0 }
  0xfd   :  { %v376_v34 = vadd.f32 %v539_v32, %v715_v38  ;;  %v370_v36 = vpop.f32.mrb[15].mxu1  ;;  %v291_v37 = vadd.f32 %v715_v38, %v290_v35 }
  0xfe   :  { %v371_v39 = vadd.f32 %v715_v38, %v370_v36  ;;  %394 = vst [vmem:[%s848_s3 + $0x78] sm:$0xff] %v296_v33 }
  0xff   :  { %410 = vst [vmem:[%s848_s3 + $0xf8] sm:$0xff] %v376_v34  ;;  %393 = vst [vmem:[%s848_s3 + $0x70] sm:$0xff] %v291_v37 }
 0x100   :  { %409 = vst [vmem:[%s848_s3 + $0xf0] sm:$0xff] %v371_v39 }

</bundles_post_ra>
